<compile_context>
chip_gen: v5e
topology: v5e:2x2
jax: 0.10.0
libtpu: 0.0.40
codegen_flags: <defaults>
</compile_context>

<pallas_src>
import functools

import jax
import jax.numpy as jnp
from jax import lax
from jax.experimental import pallas as pl
from jax.experimental.pallas import tpu as pltpu

_BN_EPS = 1e-5


def _round_up(x, m):
    return -(-x // m) * m


def _auto_tile_n(f_out):
    """Largest lane-dense tile (<=512) dividing the 128-padded feature width,
    preferring an even count of >=256-wide tiles (v7x two-TC balance)."""
    f128 = _round_up(f_out, 128)
    divisors = [c for c in (512, 384, 256, 128) if f128 % c == 0]
    tn = divisors[0]
    if (f128 // tn) % 2 == 1:
        for c in divisors:
            if c >= 256 and (f128 // c) % 2 == 0:
                tn = c
                break
    return tn


def _auto_tile_k(batch, f_in, tile_n):
    """Keep the whole contraction axis resident when the x block plus one
    weight tile fit a ~16 MiB working-set budget; otherwise K-tile."""
    resident_bytes = 2 * (batch * f_in * 2) + 2 * (f_in * tile_n * 2)
    if resident_bytes <= 16 * 1024 * 1024:
        return f_in
    k128 = _round_up(f_in, 128)
    for c in (512, 256, 128):
        if k128 % c == 0:
            return c
    return 128


def block_kernel(x_ref, w_ref, p_ref, o_ref, acc_ref):
    # x_ref:   (B, TK)  bf16 activation tile
    # w_ref:   (TK, TN) bf16 weight tile
    # p_ref:   (3, TN)  f32 fused params, rows = [bias, gamma, beta]
    # o_ref:   (B, TN)  output tile (lane-dense, TN % 128 == 0)
    # acc_ref: (B, TN)  f32 VMEM accumulator (persists across the K axis)
    k = pl.program_id(1)

    @pl.when(k == 0)
    def _():
        acc_ref[...] = jnp.zeros_like(acc_ref)

    # Linear: bf16 operands, f32 accumulation on the MXU.
    acc_ref[...] += jnp.dot(x_ref[...], w_ref[...],
                            preferred_element_type=jnp.float32)

    @pl.when(k == pl.num_programs(1) - 1)
    def _():
        y = acc_ref[...] + p_ref[0:1, :]          # + bias
        # SiLU in f32 (VPU mul + EUP sigmoid; kept f32 for v5e correctness).
        h = y * jax.nn.sigmoid(y)

        # BatchNorm1d (training mode): one-pass per-feature batch stats
        # (biased variance), f32 accumulation, clamped before rsqrt.
        inv_b = 1.0 / y.shape[0]
        s1 = jnp.sum(h, axis=0, keepdims=True)
        s2 = jnp.sum(h * h, axis=0, keepdims=True)
        mean = s1 * inv_b
        var = jnp.maximum(s2 * inv_b - mean * mean, 0.0)
        inv = lax.rsqrt(var + _BN_EPS)

        # FMA-form affine epilogue: out = h * scale + shift.
        scale = p_ref[1:2, :] * inv
        shift = p_ref[2:3, :] - mean * scale
        o_ref[...] = (h * scale + shift).astype(o_ref.dtype)


def prepare_block_params(w, b, gamma, beta, *, tile_n=None):
    """Hoisted (one-time) weight cast/pad + fused-parameter packing.

    w: (F_in, F_out) = Linear weight transposed; b/gamma/beta: (F_out,).
    Returns (w_bf16_padded, fused_params, tile_n).
    """
    f_in, f_out = w.shape
    if tile_n is None:
        tile_n = _auto_tile_n(f_out)
    assert tile_n % 128 == 0, "tile_n must be lane-dense (multiple of 128)"
    n_tiles = pl.cdiv(f_out, tile_n)
    f_pad = n_tiles * tile_n
    pad = f_pad - f_out

    w_bf = jnp.pad(w.astype(jnp.bfloat16), ((0, 0), (0, pad)))
    # Fused (bias, gamma, beta) block -> one small (3, TN) DMA per grid step.
    # gamma padded with 1.0 keeps padded lanes finite (sliced off later).
    params = jnp.stack([
        jnp.pad(b.astype(jnp.float32), (0, pad)),
        jnp.pad(gamma.astype(jnp.float32), (0, pad), constant_values=1.0),
        jnp.pad(beta.astype(jnp.float32), (0, pad)),
    ])
    return w_bf, params, tile_n


@functools.partial(jax.jit,
                   static_argnames=("f_out", "tile_n", "tile_k", "out_dtype"))
def block_forward_prepared(x, w_bf, params, *, f_out, tile_n, tile_k=None,
                           out_dtype=jnp.float32):
    """x: (B, F_in); w_bf/params from prepare_block_params -> (B, f_out)."""
    batch, f_in = x.shape
    k_w, f_pad = w_bf.shape
    assert k_w == f_in, "weight/input feature mismatch"
    assert f_pad % tile_n == 0 and tile_n % 128 == 0
    n_tiles = f_pad // tile_n

    if tile_k is None:
        tile_k = _auto_tile_k(batch, f_in, tile_n)

    x_bf = x.astype(jnp.bfloat16)
    w_in = w_bf
    if tile_k == f_in:
        k_tiles = 1
    else:
        assert tile_k % 128 == 0
        k_pad = _round_up(f_in, tile_k)
        k_tiles = k_pad // tile_k
        if k_pad != f_in:
            # TODO(synk): for huge F_in, hoist this K-pad of the weights into
            # prepare_block_params as well (rarely hit: F_in is usually 128n).
            x_bf = jnp.pad(x_bf, ((0, 0), (0, k_pad - f_in)))
            w_in = jnp.pad(w_bf, ((0, k_pad - f_in), (0, 0)))

    # Explicit VMEM budget (double-buffered tiles + scratch + f32 temporaries).
    out_itemsize = jnp.dtype(out_dtype).itemsize
    working_set = (
        2 * batch * tile_k * 2            # x tiles (bf16, 2 buffers)
        + 2 * tile_k * tile_n * 2         # weight tiles (bf16, 2 buffers)
        + 2 * 3 * tile_n * 4              # fused-param tiles
        + 2 * batch * tile_n * out_itemsize  # output tiles
        + batch * tile_n * 4              # f32 accumulator scratch
        + 4 * batch * tile_n * 4          # f32 y/h/stat temporaries headroom
    )
    vmem_limit = int(min(max(2 * working_set, 32 * 1024 * 1024),
                         128 * 1024 * 1024))

    out = pl.pallas_call(
        block_kernel,
        out_shape=jax.ShapeDtypeStruct((batch, f_pad), out_dtype),
        grid=(n_tiles, k_tiles),
        in_specs=[
            pl.BlockSpec((batch, tile_k), lambda j, k: (0, k)),   # x tile
            pl.BlockSpec((tile_k, tile_n), lambda j, k: (k, j)),  # weight tile
            pl.BlockSpec((3, tile_n), lambda j, k: (0, j)),       # fused params
        ],
        out_specs=pl.BlockSpec((batch, tile_n), lambda j, k: (0, j)),
        scratch_shapes=[pltpu.VMEM((batch, tile_n), jnp.float32)],
        compiler_params=pltpu.CompilerParams(
            dimension_semantics=("parallel", "arbitrary"),
            vmem_limit_bytes=vmem_limit,
        ),
    )(x_bf, w_in, params)
    return out[:, :f_out]


def block_forward(x, w, b, gamma, beta, *, tile_n=None, tile_k=None,
                  out_dtype=jnp.float32):
    """One-shot convenience wrapper.  When weights are reused across steps,
    prefer prepare_block_params(...) once + block_forward_prepared(...)."""
    w_bf, params, tile_n = prepare_block_params(w, b, gamma, beta,
                                                tile_n=tile_n)
    return block_forward_prepared(x, w_bf, params, f_out=w.shape[1],
                                  tile_n=tile_n, tile_k=tile_k,
                                  out_dtype=out_dtype)


if __name__ == "__main__":
    def reference(x, w, b, gamma, beta):
        # Same math on the same bf16-rounded operands, f32 accumulation,
        # classic two-pass BatchNorm form.
        xb = x.astype(jnp.bfloat16).astype(jnp.float32)
        wb = w.astype(jnp.bfloat16).astype(jnp.float32)
        y = xb @ wb + b
        h = y * jax.nn.sigmoid(y)
        m = h.mean(axis=0, keepdims=True)
        v = ((h - m) ** 2).mean(axis=0, keepdims=True)
        return (h - m) / jnp.sqrt(v + _BN_EPS) * gamma + beta

    root = jax.random.PRNGKey(0)
    k1, k2 = jax.random.split(root)

    # ---- Test 1: small shape, resident-K path, hoisted-prepare API ----
    B, F_IN, F_OUT = 8, 32, 64
    kx, kw, kb, kg, kbt = jax.random.split(k1, 5)
    x = jax.random.normal(kx, (B, F_IN), dtype=jnp.float32)
    w = jax.random.normal(kw, (F_IN, F_OUT), dtype=jnp.float32) / F_IN ** 0.5
    b = 0.1 * jax.random.normal(kb, (F_OUT,), dtype=jnp.float32)
    gamma = 1.0 + 0.1 * jax.random.normal(kg, (F_OUT,), dtype=jnp.float32)
    beta = 0.1 * jax.random.normal(kbt, (F_OUT,), dtype=jnp.float32)

    w_bf, params, tn = prepare_block_params(w, b, gamma, beta)  # hoisted once
    out = block_forward_prepared(x, w_bf, params, f_out=F_OUT, tile_n=tn)
    jax.block_until_ready(out)
    ref = reference(x, w, b, gamma, beta)
    assert out.shape == (B, F_OUT)
    err1 = float(jnp.max(jnp.abs(out - ref)))
    assert jnp.allclose(out, ref, atol=3e-3, rtol=3e-3), f"t1 max err={err1}"

    # ---- Test 2: force the K-tiled accumulator path + multi-tile N grid ----
    B2, F_IN2, F_OUT2 = 8, 256, 384
    kx2, kw2, kb2, kg2, kbt2 = jax.random.split(k2, 5)
    x2 = jax.random.normal(kx2, (B2, F_IN2), dtype=jnp.float32)
    w2 = jax.random.normal(kw2, (F_IN2, F_OUT2), dtype=jnp.float32) / F_IN2 ** 0.5
    b2 = 0.1 * jax.random.normal(kb2, (F_OUT2,), dtype=jnp.float32)
    g2 = 1.0 + 0.1 * jax.random.normal(kg2, (F_OUT2,), dtype=jnp.float32)
    bt2 = 0.1 * jax.random.normal(kbt2, (F_OUT2,), dtype=jnp.float32)

    out2 = block_forward(x2, w2, b2, g2, bt2, tile_n=128, tile_k=128)
    jax.block_until_ready(out2)
    ref2 = reference(x2, w2, b2, g2, bt2)
    assert out2.shape == (B2, F_OUT2)
    err2 = float(jnp.max(jnp.abs(out2 - ref2)))
    assert jnp.allclose(out2, ref2, atol=3e-3, rtol=3e-3), f"t2 max err={err2}"

    print("KERNEL_OK")
</pallas_src>

<mosaic_0001>
module attributes {stable_mosaic.version = 11 : i64} {
  func.func @block_kernel(%arg0: i32, %arg1: i32, %arg2: memref<8x32xbf16, #tpu.memory_space<vmem>>, %arg3: memref<32x128xbf16, #tpu.memory_space<vmem>>, %arg4: memref<3x128xf32, #tpu.memory_space<vmem>>, %arg5: memref<8x128xf32, #tpu.memory_space<vmem>>, %arg6: memref<8x128xf32, #tpu.memory_space<vmem>>) attributes {dimension_semantics = [#tpu.dimension_semantics<parallel>, #tpu.dimension_semantics<arbitrary>], iteration_bounds = array<i64: 1, 1>, scalar_prefetch = 0 : i64, scratch_operands = 1 : i64, tpu.core_type = #tpu.core_type<tc>, window_params = [{transform_indices = @transform_0, window_bounds = array<i64: 8, 32>}, {transform_indices = @transform_1, window_bounds = array<i64: 32, 128>}, {transform_indices = @transform_2, window_bounds = array<i64: 3, 128>}, {transform_indices = @transform_3, window_bounds = array<i64: 8, 128>}]} {
    %c0_i32 = arith.constant 0 : i32
    %0 = arith.cmpi eq, %arg1, %c0_i32 : i32
    %1 = arith.extui %0 : i1 to i32
    %c0_i32_0 = arith.constant 0 : i32
    %2 = arith.cmpi ne, %1, %c0_i32_0 : i32
    scf.if %2 {
      %cst_10 = arith.constant 0.000000e+00 : f32
      %12 = vector.broadcast %cst_10 : f32 to vector<8x128xf32>
      %c0_11 = arith.constant 0 : index
      %c0_12 = arith.constant 0 : index
      %13 = vector.load %arg6[%c0_11, %c0_12] : memref<8x128xf32, #tpu.memory_space<vmem>>, vector<8x128xf32>
      tpu.vector_store %arg6[%c0_11, %c0_12], %12 {strides = array<i32>} : memref<8x128xf32, #tpu.memory_space<vmem>>, vector<8x128xf32>,
    } else {
    }
    %c0 = arith.constant 0 : index
    %c0_1 = arith.constant 0 : index
    %3 = vector.load %arg6[%c0, %c0_1] : memref<8x128xf32, #tpu.memory_space<vmem>>, vector<8x128xf32>
    %c0_2 = arith.constant 0 : index
    %c0_3 = arith.constant 0 : index
    %4 = vector.load %arg2[%c0_2, %c0_3] : memref<8x32xbf16, #tpu.memory_space<vmem>>, vector<8x32xbf16>
    %c0_4 = arith.constant 0 : index
    %c0_5 = arith.constant 0 : index
    %5 = vector.load %arg3[%c0_4, %c0_5] : memref<32x128xbf16, #tpu.memory_space<vmem>>, vector<32x128xbf16>
    %cst = arith.constant dense<0.000000e+00> : vector<8x128xf32>
    %6 = tpu.matmul %4, %5, %cst {dimension_numbers = #tpu.dot_dimension_numbers<[1], [0], [0], [1], [0, 0, 1, 1], [], []>} : vector<8x32xbf16>, vector<32x128xbf16>, vector<8x128xf32> -> vector<8x128xf32>
    %7 = arith.addf %3, %6 : vector<8x128xf32>
    %c0_6 = arith.constant 0 : index
    %c0_7 = arith.constant 0 : index
    %8 = vector.load %arg6[%c0_6, %c0_7] : memref<8x128xf32, #tpu.memory_space<vmem>>, vector<8x128xf32>
    tpu.vector_store %arg6[%c0_6, %c0_7], %7 {strides = array<i32>} : memref<8x128xf32, #tpu.memory_space<vmem>>, vector<8x128xf32>,
    %c0_i32_8 = arith.constant 0 : i32
    %9 = arith.cmpi eq, %arg1, %c0_i32_8 : i32
    %10 = arith.extui %9 : i1 to i32
    %c0_i32_9 = arith.constant 0 : i32
    %11 = arith.cmpi ne, %10, %c0_i32_9 : i32
    scf.if %11 {
      %c0_10 = arith.constant 0 : index
      %c0_11 = arith.constant 0 : index
      %12 = vector.load %arg6[%c0_10, %c0_11] : memref<8x128xf32, #tpu.memory_space<vmem>>, vector<8x128xf32>
      %c0_12 = arith.constant 0 : index
      %c0_13 = arith.constant 0 : index
      %13 = vector.load %arg4[%c0_12, %c0_13] : memref<3x128xf32, #tpu.memory_space<vmem>>, vector<1x128xf32>
      %14 = vector.broadcast %13 : vector<1x128xf32> to vector<8x128xf32>
      %15 = arith.addf %12, %14 : vector<8x128xf32>
      %16 = arith.negf %15 : vector<8x128xf32>
      %17 = math.exp %16 : vector<8x128xf32>
      %cst_14 = arith.constant 1.000000e+00 : f32
      %18 = vector.broadcast %cst_14 : f32 to vector<8x128xf32>
      %19 = arith.addf %18, %17 : vector<8x128xf32>
      %20 = arith.divf %18, %19 : vector<8x128xf32>
      %21 = arith.mulf %15, %20 : vector<8x128xf32>
      %cst_15 = arith.constant dense<0.000000e+00> : vector<128xf32>
      %22 = vector.multi_reduction <add>, %21, %cst_15 [0] : vector<8x128xf32> to vector<128xf32>
      %23 = vector.shape_cast %22 : vector<128xf32> to vector<1x128xf32>
      %24 = arith.mulf %21, %21 : vector<8x128xf32>
      %cst_16 = arith.constant dense<0.000000e+00> : vector<128xf32>
      %25 = vector.multi_reduction <add>, %24, %cst_16 [0] : vector<8x128xf32> to vector<128xf32>
      %26 = vector.shape_cast %25 : vector<128xf32> to vector<1x128xf32>
      %cst_17 = arith.constant 1.250000e-01 : f32
      %27 = vector.broadcast %cst_17 : f32 to vector<1x128xf32>
      %28 = arith.mulf %23, %27 : vector<1x128xf32>
      %cst_18 = arith.constant 1.250000e-01 : f32
      %29 = vector.broadcast %cst_18 : f32 to vector<1x128xf32>
      %30 = arith.mulf %26, %29 : vector<1x128xf32>
      %31 = arith.mulf %28, %28 : vector<1x128xf32>
      %32 = arith.subf %30, %31 : vector<1x128xf32>
      %cst_19 = arith.constant 0.000000e+00 : f32
      %33 = vector.broadcast %cst_19 : f32 to vector<1x128xf32>
      %34 = arith.maximumf %32, %33 : vector<1x128xf32>
      %cst_20 = arith.constant 9.99999974E-6 : f32
      %35 = vector.broadcast %cst_20 : f32 to vector<1x128xf32>
      %36 = arith.addf %34, %35 : vector<1x128xf32>
      %37 = math.rsqrt %36 : vector<1x128xf32>
      %c1 = arith.constant 1 : index
      %c0_21 = arith.constant 0 : index
      %38 = vector.load %arg4[%c1, %c0_21] : memref<3x128xf32, #tpu.memory_space<vmem>>, vector<1x128xf32>
      %39 = arith.mulf %38, %37 : vector<1x128xf32>
      %c2 = arith.constant 2 : index
      %c0_22 = arith.constant 0 : index
      %40 = vector.load %arg4[%c2, %c0_22] : memref<3x128xf32, #tpu.memory_space<vmem>>, vector<1x128xf32>
      %41 = arith.mulf %28, %39 : vector<1x128xf32>
      %42 = arith.subf %40, %41 : vector<1x128xf32>
      %43 = vector.broadcast %39 : vector<1x128xf32> to vector<8x128xf32>
      %44 = arith.mulf %21, %43 : vector<8x128xf32>
      %45 = vector.broadcast %42 : vector<1x128xf32> to vector<8x128xf32>
      %46 = arith.addf %44, %45 : vector<8x128xf32>
      %c0_23 = arith.constant 0 : index
      %c0_24 = arith.constant 0 : index
      %47 = vector.load %arg5[%c0_23, %c0_24] : memref<8x128xf32, #tpu.memory_space<vmem>>, vector<8x128xf32>
      tpu.vector_store %arg5[%c0_23, %c0_24], %46 {strides = array<i32>} : memref<8x128xf32, #tpu.memory_space<vmem>>, vector<8x128xf32>,
    } else {
    }
    return
  }
  func.func @transform_0(%arg0: i32, %arg1: i32) -> (i32, i32) {
    %c0_i32 = arith.constant 0 : i32
    %c0_i32_0 = arith.constant 0 : i32
    return %c0_i32, %arg1 : i32, i32
  }
  func.func @transform_1(%arg0: i32, %arg1: i32) -> (i32, i32) {
    %c0_i32 = arith.constant 0 : i32
    return %arg1, %arg0 : i32, i32
  }
  func.func @transform_2(%arg0: i32, %arg1: i32) -> (i32, i32) {
    %c0_i32 = arith.constant 0 : i32
    %c0_i32_0 = arith.constant 0 : i32
    return %c0_i32, %arg0 : i32, i32
  }
  func.func @transform_3(%arg0: i32, %arg1: i32) -> (i32, i32) {
    %c0_i32 = arith.constant 0 : i32
    %c0_i32_0 = arith.constant 0 : i32
    return %c0_i32, %arg0 : i32, i32
  }
}

</mosaic_0001>

<bundles_post_ra>
// kernel: block_forward_prepared.1
= control target key start
LH: loop header
LB: loop body
LE: loop exit
PB: predicated region body
PF: predicated region fallthrough
CT: control target
= control target key end

     0   :  { %8 = vsyncpa [#allocation4], 0  ;;  %s274_s0 = inlined_call_operand.vmem [shape: bf16[8,32], index: 0, kind: input, shape index: {}]   ;;  %s275_s1 = inlined_call_operand.hbm [shape: bf16[32,128], index: 1, kind: input, shape index: {}]   ;;  %s276_s2 = inlined_call_operand.vmem [shape: f32[3,128], index: 2, kind: input, shape index: {}]   ;;  %s277_s3 = inlined_call_operand.hbm [shape: f32[8,128], index: 3, kind: output, shape index: {}]  }
   0x1   :  { %9 = vsyncpa [#allocation5], 0  ;;  %s16_s14 = sshll.u32 %s275_s1, 4  ;;  %s232_s15 = smov [#allocation3]   ;;  %s17_s14 = int_to_ptr.hbm [resolvable:$true] %s16_s14 }
   0x2   :  { %s18_s16 = sshll.u32 %s232_s15, 4  ;;  %s233_s17 = smov 64   ;;  %s19_s16 = int_to_ptr.vmem [resolvable:$true] %s18_s16 }
   0x3   :  { %s234_s18 = smov 4  }
   0x4   :  { %24 = dma.hbm_to_vmem [thread:$0]  %s17_s14, 256, %s19_s16, [#allocation4], %s233_s17, %s233_s17, %s234_s18  }
   0x5   :  { %228 = dma.done.wait [#allocation4], 256  }
   0x6   :  { %229 = vsyncadd [#allocation4], 4294967040  ;;  %v168_v0 = vld [vmem:[#allocation3 + $0x8] sm:$0xff]  ;;  %v167_v1 = vld [vmem:[#allocation3] sm:$0xff]  ;;  %vm55_vm0 = vcmask 261120   ;;  %s235_s25 = smov [#allocation6]  }
   0x7   :  { %65 = vmatpush.bf16.msra.mxu0 %v168_v0  ;;  %v38_v2 = vld [vmem:[%s274_s0] sm:$0xf]  ;;  %s145_s26 = sshll.u32 %s235_s25, 4  ;;  %s147_s29 = sshll.u32 %s277_s3, 4  ;;  %s146_s26 = int_to_ptr.vmem [resolvable:$true] %s145_s26  ;;  %s148_s29 = int_to_ptr.hbm [resolvable:$true] %s147_s29 }
   0x8   :  { %v173_v3 = vld [vmem:[%s276_s2] ss:$0 sm:$0xff]  ;;  %v130_v46 = vld [vmem:[%s276_s2 + $0x1] sm:$0x1]  ;;  %v132_v49 = vld [vmem:[%s276_s2 + $0x2] sm:$0x1] }
   0xb   :  { %66 = vmatpush.bf16.msra.mxu0 %v167_v1 }
   0xe   :  { %165 = vmatmul.msk.bf16.vlgmr.msra.gmra.mxu0 %vm55_vm0, %v38_v2 }
  0x8b   :  { %v68_v4 = vpop.f32.mrf.mxu0 }
  0x8c   :  { %v80_v5 = vadd.f32 %v173_v3, %v68_v4 }
  0x8e   :  { %v166_v6 = vmul.f32 -1.442695, %v80_v5 }
  0x90   :  { %174 = vpow2.f32 %v166_v6 }
  0x93   :  { %v70_v7 = vpop.f32.mrf.mxu0 }
  0x96   :  { %v175_v8 = vpop.eup %174 }
  0x97   :  { %v84_v9 = vadd.f32 1.0, %v175_v8 }
  0x99   :  { %176 = vrcp.f32 %v84_v9  ;;  %v96_v13 = vand.u32 2147483648, %v84_v9  ;;  %v94_v15 = vand.u32 2147483647, %v84_v9  ;;  %vm90_vm2 = vweird.f32 %v84_v9 }
  0x9b   :  { %v97_v17 = vor.u32 1.1754944e-38, %v96_v13  ;;  %vm95_vm4 = vcmp.eq.f32.partialorder %v94_v15, 8.507059e+37 }
  0x9f   :  { %v177_v10 = vpop.eup %176 }
  0xa0   :  { %v86_v11 = vmul.f32 %v177_v10, %v84_v9  ;;  %vm91_vm1 = vweird.f32 %v177_v10 }
  0xa1   :  { %vm92_vm3 = vmor %vm90_vm2, %vm91_vm1 }
  0xa2   :  { %v87_v12 = vsub.f32 1.0, %v86_v11 }
  0xa4   :  { %v88_v14 = vmul.f32 %v177_v10, %v87_v12 }
  0xa6   :  { %v89_v16 = vadd.f32 %v177_v10, %v88_v14 }
  0xa8   :  { %v93_v18 = vsel %vm92_vm3, %v177_v10, %v89_v16 }
  0xa9   :  { %v98_v19 = vsel %vm95_vm4, %v97_v17, %v93_v18 }
  0xaa   :  { %v100_v20 = vmul.f32 %v98_v19, %v80_v5 }
  0xac   :  { %v101_v21 = vrot.slane %v100_v20, 4  ;;  %v107_v22 = vmul.f32 %v100_v20, %v100_v20 }
  0xae   :  { %v102_v23 = vadd.f32 %v101_v21, %v100_v20  ;;  %v108_v24 = vrot.slane %v107_v22, 4 }
  0xb0   :  { %v103_v25 = vrot.slane %v102_v23, 2  ;;  %v109_v26 = vadd.f32 %v108_v24, %v107_v22 }
  0xb2   :  { %v104_v27 = vadd.f32 %v103_v25, %v102_v23  ;;  %v110_v28 = vrot.slane %v109_v26, 2 }
  0xb4   :  { %v111_v29 = vadd.f32 %v110_v28, %v109_v26  ;;  %v105_v30 = vrot.slane %v104_v27, 1 }
  0xb6   :  { %v112_v31 = vrot.slane %v111_v29, 1  ;;  %v106_v32 = vadd.f32 %v105_v30, %v104_v27 }
  0xb8   :  { %v113_v33 = vadd.f32 %v112_v31, %v111_v29  ;;  %v114_v34 = vmul.f32 0.125, %v106_v32 }
  0xba   :  { %v115_v35 = vmul.f32 0.125, %v113_v33  ;;  %v116_v36 = vmul.f32 %v114_v34, %v114_v34 }
  0xbc   :  { %v117_v37 = vsub.f32 %v115_v35, %v116_v36 }
  0xbe   :  { %v118_v38 = vmax.f32 %v117_v37, 0.0 }
  0xc0   :  { %v119_v39 = vadd.f32 1e-05, %v118_v38 }
  0xc2   :  { %178 = vrsqrt.f32 %v119_v39  ;;  %vm126_vm6 = vweird.f32 %v119_v39 }
  0xc8   :  { %v179_v40 = vpop.eup %178 }
  0xc9   :  { %v121_v41 = vmul.f32 %v179_v40, %v119_v39  ;;  %vm127_vm5 = vweird.f32 %v179_v40 }
  0xca   :  { %vm128_vm7 = vmor %vm126_vm6, %vm127_vm5 }
  0xcb   :  { %v122_v42 = vmul.f32 %v179_v40, %v121_v41 }
  0xcd   :  { %v123_v43 = vmul.f32 0.5, %v122_v42 }
  0xcf   :  { %v124_v44 = vsub.f32 1.5, %v123_v43 }
  0xd1   :  { %v125_v45 = vmul.f32 %v179_v40, %v124_v44 }
  0xd3   :  { %v129_v47 = vsel %vm128_vm7, %v179_v40, %v125_v45 }
  0xd4   :  { %v131_v48 = vmul.f32 %v130_v46, %v129_v47 }
  0xd6   :  { %v133_v50 = vmul.f32 %v131_v48, %v114_v34  ;;  %v135_v51 = vperm.slane %v131_v48, 0 }
  0xd8   :  { %v134_v52 = vsub.f32 %v132_v49, %v133_v50  ;;  %v136_v53 = vmul.f32 %v135_v51, %v100_v20 }
  0xda   :  { %v137_v54 = vperm.slane %v134_v52, 0 }
  0xdc   :  { %v138_v55 = vadd.f32 %v137_v54, %v136_v53 }
  0xde   :  { %139 = vst [vmem:[#allocation6] sm:$0xff] %v138_v55 }
  0xdf   :  { %150 = dma.vmem_to_hbm [thread:$0]  %s146_s26, 128, %s148_s29, [#allocation5]  }
  0xe0   :  { %230 = dma.done.wait [#allocation5], 128  }
  0xe1   :  { %231 = vsyncadd [#allocation5], 4294967168 }
  0xe2   :  { %155 = vsyncpa [#allocation4], 1 }
  0xe3   :  { %156 = vsyncpa [#allocation5], 1 }

</bundles_post_ra>
